<compile_context>
chip_gen: v7x
topology: tpu7x:2x2x1
jax: 0.10.0
libtpu: 0.0.40
codegen_flags: <defaults>
</compile_context>

<pallas_src>
import functools

import jax
import jax.numpy as jnp
from jax import lax
from jax.experimental import pallas as pl
from jax.experimental.pallas import tpu as pltpu


def _round_up(x, m):
    return (x + m - 1) // m * m


def _dice_partial_kernel(score_ref, target_ref, acc_ref, *,
                         n_classes, spatial_len, tile, ragged):
    """score_ref: (N, C, T) float block; target_ref: (N, T) int block;
    acc_ref: (3, C) f32 SMEM output, resident across the whole grid."""
    step = pl.program_id(0)

    @pl.when(step == 0)
    def _init():
        for i in range(n_classes):
            acc_ref[0, i] = jnp.float32(0.0)
            acc_ref[1, i] = jnp.float32(0.0)
            acc_ref[2, i] = jnp.float32(0.0)

    # Label tile: read from VMEM once, reused for all classes.
    tgt = target_ref[...]                                      # (N, T) int

    if ragged:
        # Last tile may extend past the real spatial extent; OOB lanes hold
        # unspecified data, so build a validity mask once per tile.
        n_rows = tgt.shape[0]
        lane_idx = lax.broadcasted_iota(jnp.int32, (n_rows, tile), 1)
        remaining = spatial_len - step * tile                  # traced scalar
        valid = lane_idx < remaining                           # (N, T) bool

    # Per-class partial reductions.  Slicing the ref (not a loaded value)
    # keeps the live vreg working set to one (N, T) slab at a time.
    for i in range(n_classes):
        si = score_ref[:, i, :].astype(jnp.float32)            # (N, T)
        mask = tgt == i                                        # fused one-hot
        if ragged:
            si = jnp.where(valid, si, 0.0)                     # zero OOB garbage
            mask = jnp.logical_and(mask, valid)
        acc_ref[0, i] += jnp.sum(jnp.where(mask, si, 0.0))     # sum(s * t)
        acc_ref[1, i] += jnp.sum(si * si)                      # sum(s * s)
        acc_ref[2, i] += jnp.sum(mask.astype(jnp.float32))     # sum(t * t) == sum(t)


def dice_loss(inputs, target, weight=None, softmax=False):
    """Pallas implementation of DiceLoss.forward (default path:
    one_hot=True, argmax=False, weighted_pixel_map=None).

    inputs: (N, C, H, W) float (f32 or bf16) — per-class scores/probabilities.
    target: (N, H, W) integer class labels.
    """
    # TODO(synk): argmax=True / one_hot=False / weighted_pixel_map paths are
    # not implemented; only the default forward path is translated.
    N, C, H, W = inputs.shape
    if softmax:
        inputs = jax.nn.softmax(inputs, axis=1)   # JAX glue, matches F.softmax(dim=1)
    if not jnp.issubdtype(inputs.dtype, jnp.floating):
        inputs = inputs.astype(jnp.float32)

    # --- lane-dense layout: flatten spatial dims (free, contiguous reshapes) --
    L = H * W
    score = inputs.reshape(N, C, L)
    tgt = target.reshape(N, L)
    if not jnp.issubdtype(tgt.dtype, jnp.integer):
        tgt = tgt.astype(jnp.int32)

    # --- spatial tile size: fit double-buffered tiles in default scoped VMEM --
    score_itemsize = jnp.dtype(score.dtype).itemsize
    tgt_itemsize = jnp.dtype(tgt.dtype).itemsize
    c_pad = _round_up(C, 8)                                   # sublane padding (rough)
    n_pad_tgt = _round_up(N, max(8, 32 // max(tgt_itemsize, 1)))
    bytes_per_lane = (N * c_pad * score_itemsize + n_pad_tgt * tgt_itemsize)
    budget = 4 * 1024 * 1024                                  # per pipeline buffer (~8 MiB 2x-buffered)
    T = max(128, (budget // bytes_per_lane) // 128 * 128)
    T = min(T, 16384)                                         # keep per-step vector work sane
    T = min(T, _round_up(L, 128))
    num_tiles = pl.cdiv(L, T)
    ragged = (L % T) != 0                                     # compile-time flag

    kernel = functools.partial(_dice_partial_kernel, n_classes=C,
                               spatial_len=L, tile=T, ragged=ragged)

    partials = pl.pallas_call(
        kernel,
        out_shape=jax.ShapeDtypeStruct((3, C), jnp.float32),
        grid=(num_tiles,),
        in_specs=[
            # score tile: all samples, all classes, one spatial window.
            pl.BlockSpec((N, C, T), lambda s: (0, 0, s)),
            # label tile: all samples, same spatial window (read once per tile,
            # reused for every class inside the kernel).
            pl.BlockSpec((N, T), lambda s: (0, s)),
        ],
        out_specs=pl.BlockSpec(memory_space=pltpu.SMEM),
        compiler_params=pltpu.CompilerParams(
            # spatial axis accumulates into the resident SMEM output -> reduction
            dimension_semantics=("arbitrary",)),
    )(score, tgt)

    # --- O(C) epilogue in JAX: dice per class + weighted mean -----------------
    smooth = jnp.float32(1e-10)
    if weight is None:
        weight = jnp.ones((C,), jnp.float32)
    else:
        weight = jnp.asarray(weight, jnp.float32)
    intersection = 2.0 * partials[0] + smooth
    union = partials[1] + partials[2] + smooth
    dice = 1.0 - intersection / union
    return jnp.sum(weight * dice) / C


def _dice_loss_reference(inputs, target, n_classes, weight=None, softmax=False):
    """Plain-JAX reference mirroring the PyTorch module (for verification)."""
    if softmax:
        inputs = jax.nn.softmax(inputs, axis=1)
    if weight is None:
        weight = [1.0] * n_classes
    smooth = 1e-10
    onehot = (target[:, None, :, :] == jnp.arange(n_classes)[None, :, None, None]
              ).astype(jnp.float32)
    loss = 0.0
    for i in range(n_classes):
        s = inputs[:, i].astype(jnp.float32)
        t = onehot[:, i]
        inter = 2.0 * jnp.sum(s * t) + smooth
        union = jnp.sum(s * s) + jnp.sum(t * t) + smooth
        loss = loss + (1.0 - inter / union) * weight[i]
    return loss / n_classes


if __name__ == "__main__":
    key = jax.random.PRNGKey(0)
    k1, k2 = jax.random.split(key)

    N, C, H, W = 2, 4, 16, 16
    logits = jax.random.normal(k1, (N, C, H, W), dtype=jnp.float32)
    inputs = jax.nn.softmax(logits, axis=1)            # probabilities, like a net output
    target = jax.random.randint(k2, (N, H, W), 0, C)   # integer label map

    loss = dice_loss(inputs, target)
    loss = jax.block_until_ready(loss)

    ref = _dice_loss_reference(inputs, target, C)
    assert jnp.allclose(loss, ref, atol=1e-5, rtol=1e-5), (loss, ref)

    print("KERNEL_OK")
</pallas_src>

<mosaic_0001>
module attributes {stable_mosaic.version = 11 : i64} {
  func.func @_dice_partial_kernel(%arg0: i32, %arg1: memref<2x4x256xf32, #tpu.memory_space<vmem>>, %arg2: memref<2x256xi32, #tpu.memory_space<vmem>>, %arg3: memref<3x4xf32, #tpu.memory_space<smem>>) attributes {dimension_semantics = [#tpu.dimension_semantics<arbitrary>], iteration_bounds = array<i64: 1>, scalar_prefetch = 0 : i64, scratch_operands = 0 : i64, tpu.core_type = #tpu.core_type<tc>, window_params = [{transform_indices = @transform_0, window_bounds = array<i64: 2, 4, 256>}, {transform_indices = @transform_1, window_bounds = array<i64: 2, 256>}, {transform_indices = @transform_2, window_bounds = array<i64: 3, 4>}]} {
    %c0_i32 = arith.constant 0 : i32
    %0 = arith.cmpi eq, %arg0, %c0_i32 : i32
    %1 = arith.extui %0 : i1 to i32
    %c0_i32_0 = arith.constant 0 : i32
    %2 = arith.cmpi ne, %1, %c0_i32_0 : i32
    scf.if %2 {
      %cst_75 = arith.constant 0.000000e+00 : f32
      %c0_76 = arith.constant 0 : index
      %c0_77 = arith.constant 0 : index
      %124 = memref.load %arg3[%c0_76, %c0_77] : memref<3x4xf32, #tpu.memory_space<smem>>
      memref.store %cst_75, %arg3[%c0_76, %c0_77] : memref<3x4xf32, #tpu.memory_space<smem>>
      %cst_78 = arith.constant 0.000000e+00 : f32
      %c1_79 = arith.constant 1 : index
      %c0_80 = arith.constant 0 : index
      %125 = memref.load %arg3[%c1_79, %c0_80] : memref<3x4xf32, #tpu.memory_space<smem>>
      memref.store %cst_78, %arg3[%c1_79, %c0_80] : memref<3x4xf32, #tpu.memory_space<smem>>
      %cst_81 = arith.constant 0.000000e+00 : f32
      %c2_82 = arith.constant 2 : index
      %c0_83 = arith.constant 0 : index
      %126 = memref.load %arg3[%c2_82, %c0_83] : memref<3x4xf32, #tpu.memory_space<smem>>
      memref.store %cst_81, %arg3[%c2_82, %c0_83] : memref<3x4xf32, #tpu.memory_space<smem>>
      %cst_84 = arith.constant 0.000000e+00 : f32
      %c0_85 = arith.constant 0 : index
      %c1_86 = arith.constant 1 : index
      %127 = memref.load %arg3[%c0_85, %c1_86] : memref<3x4xf32, #tpu.memory_space<smem>>
      memref.store %cst_84, %arg3[%c0_85, %c1_86] : memref<3x4xf32, #tpu.memory_space<smem>>
      %cst_87 = arith.constant 0.000000e+00 : f32
      %c1_88 = arith.constant 1 : index
      %c1_89 = arith.constant 1 : index
      %128 = memref.load %arg3[%c1_88, %c1_89] : memref<3x4xf32, #tpu.memory_space<smem>>
      memref.store %cst_87, %arg3[%c1_88, %c1_89] : memref<3x4xf32, #tpu.memory_space<smem>>
      %cst_90 = arith.constant 0.000000e+00 : f32
      %c2_91 = arith.constant 2 : index
      %c1_92 = arith.constant 1 : index
      %129 = memref.load %arg3[%c2_91, %c1_92] : memref<3x4xf32, #tpu.memory_space<smem>>
      memref.store %cst_90, %arg3[%c2_91, %c1_92] : memref<3x4xf32, #tpu.memory_space<smem>>
      %cst_93 = arith.constant 0.000000e+00 : f32
      %c0_94 = arith.constant 0 : index
      %c2_95 = arith.constant 2 : index
      %130 = memref.load %arg3[%c0_94, %c2_95] : memref<3x4xf32, #tpu.memory_space<smem>>
      memref.store %cst_93, %arg3[%c0_94, %c2_95] : memref<3x4xf32, #tpu.memory_space<smem>>
      %cst_96 = arith.constant 0.000000e+00 : f32
      %c1_97 = arith.constant 1 : index
      %c2_98 = arith.constant 2 : index
      %131 = memref.load %arg3[%c1_97, %c2_98] : memref<3x4xf32, #tpu.memory_space<smem>>
      memref.store %cst_96, %arg3[%c1_97, %c2_98] : memref<3x4xf32, #tpu.memory_space<smem>>
      %cst_99 = arith.constant 0.000000e+00 : f32
      %c2_100 = arith.constant 2 : index
      %c2_101 = arith.constant 2 : index
      %132 = memref.load %arg3[%c2_100, %c2_101] : memref<3x4xf32, #tpu.memory_space<smem>>
      memref.store %cst_99, %arg3[%c2_100, %c2_101] : memref<3x4xf32, #tpu.memory_space<smem>>
      %cst_102 = arith.constant 0.000000e+00 : f32
      %c0_103 = arith.constant 0 : index
      %c3_104 = arith.constant 3 : index
      %133 = memref.load %arg3[%c0_103, %c3_104] : memref<3x4xf32, #tpu.memory_space<smem>>
      memref.store %cst_102, %arg3[%c0_103, %c3_104] : memref<3x4xf32, #tpu.memory_space<smem>>
      %cst_105 = arith.constant 0.000000e+00 : f32
      %c1_106 = arith.constant 1 : index
      %c3_107 = arith.constant 3 : index
      %134 = memref.load %arg3[%c1_106, %c3_107] : memref<3x4xf32, #tpu.memory_space<smem>>
      memref.store %cst_105, %arg3[%c1_106, %c3_107] : memref<3x4xf32, #tpu.memory_space<smem>>
      %cst_108 = arith.constant 0.000000e+00 : f32
      %c2_109 = arith.constant 2 : index
      %c3_110 = arith.constant 3 : index
      %135 = memref.load %arg3[%c2_109, %c3_110] : memref<3x4xf32, #tpu.memory_space<smem>>
      memref.store %cst_108, %arg3[%c2_109, %c3_110] : memref<3x4xf32, #tpu.memory_space<smem>>
    } else {
    }
    %c0 = arith.constant 0 : index
    %c0_1 = arith.constant 0 : index
    %3 = vector.load %arg2[%c0, %c0_1] : memref<2x256xi32, #tpu.memory_space<vmem>>, vector<2x256xi32>
    %c0_2 = arith.constant 0 : index
    %c0_3 = arith.constant 0 : index
    %c0_4 = arith.constant 0 : index
    %4 = vector.load %arg1[%c0_2, %c0_3, %c0_4] : memref<2x4x256xf32, #tpu.memory_space<vmem>>, vector<2x1x256xf32>
    %5 = vector.shape_cast %4 : vector<2x1x256xf32> to vector<2x256xf32>
    %c0_i32_5 = arith.constant 0 : i32
    %6 = vector.broadcast %c0_i32_5 : i32 to vector<2x256xi32>
    %7 = arith.cmpi eq, %3, %6 : vector<2x256xi32>
    %c0_6 = arith.constant 0 : index
    %c0_7 = arith.constant 0 : index
    %8 = memref.load %arg3[%c0_6, %c0_7] : memref<3x4xf32, #tpu.memory_space<smem>>
    %cst = arith.constant 0.000000e+00 : f32
    %9 = vector.broadcast %cst : f32 to vector<2x256xf32>
    %10 = arith.select %7, %5, %9 : vector<2x256xi1>, vector<2x256xf32>
    %11 = vector.shape_cast %10 : vector<2x256xf32> to vector<1x2x256xf32>
    %cst_8 = arith.constant dense<0.000000e+00> : vector<1xf32>
    %12 = vector.multi_reduction <add>, %11, %cst_8 [1, 2] : vector<1x2x256xf32> to vector<1xf32>
    %13 = vector.shape_cast %12 : vector<1xf32> to vector<1x1x1xf32>
    %14 = vector.extract %13[0, 0, 0] : f32 from vector<1x1x1xf32>
    %15 = arith.addf %8, %14 : f32
    %c0_9 = arith.constant 0 : index
    %c0_10 = arith.constant 0 : index
    %16 = memref.load %arg3[%c0_9, %c0_10] : memref<3x4xf32, #tpu.memory_space<smem>>
    memref.store %15, %arg3[%c0_9, %c0_10] : memref<3x4xf32, #tpu.memory_space<smem>>
    %c1 = arith.constant 1 : index
    %c0_11 = arith.constant 0 : index
    %17 = memref.load %arg3[%c1, %c0_11] : memref<3x4xf32, #tpu.memory_space<smem>>
    %18 = arith.mulf %5, %5 : vector<2x256xf32>
    %19 = vector.shape_cast %18 : vector<2x256xf32> to vector<1x2x256xf32>
    %cst_12 = arith.constant dense<0.000000e+00> : vector<1xf32>
    %20 = vector.multi_reduction <add>, %19, %cst_12 [1, 2] : vector<1x2x256xf32> to vector<1xf32>
    %21 = vector.shape_cast %20 : vector<1xf32> to vector<1x1x1xf32>
    %22 = vector.extract %21[0, 0, 0] : f32 from vector<1x1x1xf32>
    %23 = arith.addf %17, %22 : f32
    %c1_13 = arith.constant 1 : index
    %c0_14 = arith.constant 0 : index
    %24 = memref.load %arg3[%c1_13, %c0_14] : memref<3x4xf32, #tpu.memory_space<smem>>
    memref.store %23, %arg3[%c1_13, %c0_14] : memref<3x4xf32, #tpu.memory_space<smem>>
    %c2 = arith.constant 2 : index
    %c0_15 = arith.constant 0 : index
    %25 = memref.load %arg3[%c2, %c0_15] : memref<3x4xf32, #tpu.memory_space<smem>>
    %26 = arith.extui %7 : vector<2x256xi1> to vector<2x256xi32>
    %27 = arith.sitofp %26 : vector<2x256xi32> to vector<2x256xf32>
    %28 = vector.shape_cast %27 : vector<2x256xf32> to vector<1x2x256xf32>
    %cst_16 = arith.constant dense<0.000000e+00> : vector<1xf32>
    %29 = vector.multi_reduction <add>, %28, %cst_16 [1, 2] : vector<1x2x256xf32> to vector<1xf32>
    %30 = vector.shape_cast %29 : vector<1xf32> to vector<1x1x1xf32>
    %31 = vector.extract %30[0, 0, 0] : f32 from vector<1x1x1xf32>
    %32 = arith.addf %25, %31 : f32
    %c2_17 = arith.constant 2 : index
    %c0_18 = arith.constant 0 : index
    %33 = memref.load %arg3[%c2_17, %c0_18] : memref<3x4xf32, #tpu.memory_space<smem>>
    memref.store %32, %arg3[%c2_17, %c0_18] : memref<3x4xf32, #tpu.memory_space<smem>>
    %c0_19 = arith.constant 0 : index
    %c1_20 = arith.constant 1 : index
    %c0_21 = arith.constant 0 : index
    %34 = vector.load %arg1[%c0_19, %c1_20, %c0_21] : memref<2x4x256xf32, #tpu.memory_space<vmem>>, vector<2x1x256xf32>
    %35 = vector.shape_cast %34 : vector<2x1x256xf32> to vector<2x256xf32>
    %c1_i32 = arith.constant 1 : i32
    %36 = vector.broadcast %c1_i32 : i32 to vector<2x256xi32>
    %37 = arith.cmpi eq, %3, %36 : vector<2x256xi32>
    %c0_22 = arith.constant 0 : index
    %c1_23 = arith.constant 1 : index
    %38 = memref.load %arg3[%c0_22, %c1_23] : memref<3x4xf32, #tpu.memory_space<smem>>
    %cst_24 = arith.constant 0.000000e+00 : f32
    %39 = vector.broadcast %cst_24 : f32 to vector<2x256xf32>
    %40 = arith.select %37, %35, %39 : vector<2x256xi1>, vector<2x256xf32>
    %41 = vector.shape_cast %40 : vector<2x256xf32> to vector<1x2x256xf32>
    %cst_25 = arith.constant dense<0.000000e+00> : vector<1xf32>
    %42 = vector.multi_reduction <add>, %41, %cst_25 [1, 2] : vector<1x2x256xf32> to vector<1xf32>
    %43 = vector.shape_cast %42 : vector<1xf32> to vector<1x1x1xf32>
    %44 = vector.extract %43[0, 0, 0] : f32 from vector<1x1x1xf32>
    %45 = arith.addf %38, %44 : f32
    %c0_26 = arith.constant 0 : index
    %c1_27 = arith.constant 1 : index
    %46 = memref.load %arg3[%c0_26, %c1_27] : memref<3x4xf32, #tpu.memory_space<smem>>
    memref.store %45, %arg3[%c0_26, %c1_27] : memref<3x4xf32, #tpu.memory_space<smem>>
    %c1_28 = arith.constant 1 : index
    %c1_29 = arith.constant 1 : index
    %47 = memref.load %arg3[%c1_28, %c1_29] : memref<3x4xf32, #tpu.memory_space<smem>>
    %48 = arith.mulf %35, %35 : vector<2x256xf32>
    %49 = vector.shape_cast %48 : vector<2x256xf32> to vector<1x2x256xf32>
    %cst_30 = arith.constant dense<0.000000e+00> : vector<1xf32>
    %50 = vector.multi_reduction <add>, %49, %cst_30 [1, 2] : vector<1x2x256xf32> to vector<1xf32>
    %51 = vector.shape_cast %50 : vector<1xf32> to vector<1x1x1xf32>
    %52 = vector.extract %51[0, 0, 0] : f32 from vector<1x1x1xf32>
    %53 = arith.addf %47, %52 : f32
    %c1_31 = arith.constant 1 : index
    %c1_32 = arith.constant 1 : index
    %54 = memref.load %arg3[%c1_31, %c1_32] : memref<3x4xf32, #tpu.memory_space<smem>>
    memref.store %53, %arg3[%c1_31, %c1_32] : memref<3x4xf32, #tpu.memory_space<smem>>
    %c2_33 = arith.constant 2 : index
    %c1_34 = arith.constant 1 : index
    %55 = memref.load %arg3[%c2_33, %c1_34] : memref<3x4xf32, #tpu.memory_space<smem>>
    %56 = arith.extui %37 : vector<2x256xi1> to vector<2x256xi32>
    %57 = arith.sitofp %56 : vector<2x256xi32> to vector<2x256xf32>
    %58 = vector.shape_cast %57 : vector<2x256xf32> to vector<1x2x256xf32>
    %cst_35 = arith.constant dense<0.000000e+00> : vector<1xf32>
    %59 = vector.multi_reduction <add>, %58, %cst_35 [1, 2] : vector<1x2x256xf32> to vector<1xf32>
    %60 = vector.shape_cast %59 : vector<1xf32> to vector<1x1x1xf32>
    %61 = vector.extract %60[0, 0, 0] : f32 from vector<1x1x1xf32>
    %62 = arith.addf %55, %61 : f32
    %c2_36 = arith.constant 2 : index
    %c1_37 = arith.constant 1 : index
    %63 = memref.load %arg3[%c2_36, %c1_37] : memref<3x4xf32, #tpu.memory_space<smem>>
    memref.store %62, %arg3[%c2_36, %c1_37] : memref<3x4xf32, #tpu.memory_space<smem>>
    %c0_38 = arith.constant 0 : index
    %c2_39 = arith.constant 2 : index
    %c0_40 = arith.constant 0 : index
    %64 = vector.load %arg1[%c0_38, %c2_39, %c0_40] : memref<2x4x256xf32, #tpu.memory_space<vmem>>, vector<2x1x256xf32>
    %65 = vector.shape_cast %64 : vector<2x1x256xf32> to vector<2x256xf32>
    %c2_i32 = arith.constant 2 : i32
    %66 = vector.broadcast %c2_i32 : i32 to vector<2x256xi32>
    %67 = arith.cmpi eq, %3, %66 : vector<2x256xi32>
    %c0_41 = arith.constant 0 : index
    %c2_42 = arith.constant 2 : index
    %68 = memref.load %arg3[%c0_41, %c2_42] : memref<3x4xf32, #tpu.memory_space<smem>>
    %cst_43 = arith.constant 0.000000e+00 : f32
    %69 = vector.broadcast %cst_43 : f32 to vector<2x256xf32>
    %70 = arith.select %67, %65, %69 : vector<2x256xi1>, vector<2x256xf32>
    %71 = vector.shape_cast %70 : vector<2x256xf32> to vector<1x2x256xf32>
    %cst_44 = arith.constant dense<0.000000e+00> : vector<1xf32>
    %72 = vector.multi_reduction <add>, %71, %cst_44 [1, 2] : vector<1x2x256xf32> to vector<1xf32>
    %73 = vector.shape_cast %72 : vector<1xf32> to vector<1x1x1xf32>
    %74 = vector.extract %73[0, 0, 0] : f32 from vector<1x1x1xf32>
    %75 = arith.addf %68, %74 : f32
    %c0_45 = arith.constant 0 : index
    %c2_46 = arith.constant 2 : index
    %76 = memref.load %arg3[%c0_45, %c2_46] : memref<3x4xf32, #tpu.memory_space<smem>>
    memref.store %75, %arg3[%c0_45, %c2_46] : memref<3x4xf32, #tpu.memory_space<smem>>
    %c1_47 = arith.constant 1 : index
    %c2_48 = arith.constant 2 : index
    %77 = memref.load %arg3[%c1_47, %c2_48] : memref<3x4xf32, #tpu.memory_space<smem>>
    %78 = arith.mulf %65, %65 : vector<2x256xf32>
    %79 = vector.shape_cast %78 : vector<2x256xf32> to vector<1x2x256xf32>
    %cst_49 = arith.constant dense<0.000000e+00> : vector<1xf32>
    %80 = vector.multi_reduction <add>, %79, %cst_49 [1, 2] : vector<1x2x256xf32> to vector<1xf32>
    %81 = vector.shape_cast %80 : vector<1xf32> to vector<1x1x1xf32>
    %82 = vector.extract %81[0, 0, 0] : f32 from vector<1x1x1xf32>
    %83 = arith.addf %77, %82 : f32
    %c1_50 = arith.constant 1 : index
    %c2_51 = arith.constant 2 : index
    %84 = memref.load %arg3[%c1_50, %c2_51] : memref<3x4xf32, #tpu.memory_space<smem>>
    memref.store %83, %arg3[%c1_50, %c2_51] : memref<3x4xf32, #tpu.memory_space<smem>>
    %c2_52 = arith.constant 2 : index
    %c2_53 = arith.constant 2 : index
    %85 = memref.load %arg3[%c2_52, %c2_53] : memref<3x4xf32, #tpu.memory_space<smem>>
    %86 = arith.extui %67 : vector<2x256xi1> to vector<2x256xi32>
    %87 = arith.sitofp %86 : vector<2x256xi32> to vector<2x256xf32>
    %88 = vector.shape_cast %87 : vector<2x256xf32> to vector<1x2x256xf32>
    %cst_54 = arith.constant dense<0.000000e+00> : vector<1xf32>
    %89 = vector.multi_reduction <add>, %88, %cst_54 [1, 2] : vector<1x2x256xf32> to vector<1xf32>
    %90 = vector.shape_cast %89 : vector<1xf32> to vector<1x1x1xf32>
    %91 = vector.extract %90[0, 0, 0] : f32 from vector<1x1x1xf32>
    %92 = arith.addf %85, %91 : f32
    %c2_55 = arith.constant 2 : index
    %c2_56 = arith.constant 2 : index
    %93 = memref.load %arg3[%c2_55, %c2_56] : memref<3x4xf32, #tpu.memory_space<smem>>
    memref.store %92, %arg3[%c2_55, %c2_56] : memref<3x4xf32, #tpu.memory_space<smem>>
    %c0_57 = arith.constant 0 : index
    %c3 = arith.constant 3 : index
    %c0_58 = arith.constant 0 : index
    %94 = vector.load %arg1[%c0_57, %c3, %c0_58] : memref<2x4x256xf32, #tpu.memory_space<vmem>>, vector<2x1x256xf32>
    %95 = vector.shape_cast %94 : vector<2x1x256xf32> to vector<2x256xf32>
    %c3_i32 = arith.constant 3 : i32
    %96 = vector.broadcast %c3_i32 : i32 to vector<2x256xi32>
    %97 = arith.cmpi eq, %3, %96 : vector<2x256xi32>
    %c0_59 = arith.constant 0 : index
    %c3_60 = arith.constant 3 : index
    %98 = memref.load %arg3[%c0_59, %c3_60] : memref<3x4xf32, #tpu.memory_space<smem>>
    %cst_61 = arith.constant 0.000000e+00 : f32
    %99 = vector.broadcast %cst_61 : f32 to vector<2x256xf32>
    %100 = arith.select %97, %95, %99 : vector<2x256xi1>, vector<2x256xf32>
    %101 = vector.shape_cast %100 : vector<2x256xf32> to vector<1x2x256xf32>
    %cst_62 = arith.constant dense<0.000000e+00> : vector<1xf32>
    %102 = vector.multi_reduction <add>, %101, %cst_62 [1, 2] : vector<1x2x256xf32> to vector<1xf32>
    %103 = vector.shape_cast %102 : vector<1xf32> to vector<1x1x1xf32>
    %104 = vector.extract %103[0, 0, 0] : f32 from vector<1x1x1xf32>
    %105 = arith.addf %98, %104 : f32
    %c0_63 = arith.constant 0 : index
    %c3_64 = arith.constant 3 : index
    %106 = memref.load %arg3[%c0_63, %c3_64] : memref<3x4xf32, #tpu.memory_space<smem>>
    memref.store %105, %arg3[%c0_63, %c3_64] : memref<3x4xf32, #tpu.memory_space<smem>>
    %c1_65 = arith.constant 1 : index
    %c3_66 = arith.constant 3 : index
    %107 = memref.load %arg3[%c1_65, %c3_66] : memref<3x4xf32, #tpu.memory_space<smem>>
    %108 = arith.mulf %95, %95 : vector<2x256xf32>
    %109 = vector.shape_cast %108 : vector<2x256xf32> to vector<1x2x256xf32>
    %cst_67 = arith.constant dense<0.000000e+00> : vector<1xf32>
    %110 = vector.multi_reduction <add>, %109, %cst_67 [1, 2] : vector<1x2x256xf32> to vector<1xf32>
    %111 = vector.shape_cast %110 : vector<1xf32> to vector<1x1x1xf32>
    %112 = vector.extract %111[0, 0, 0] : f32 from vector<1x1x1xf32>
    %113 = arith.addf %107, %112 : f32
    %c1_68 = arith.constant 1 : index
    %c3_69 = arith.constant 3 : index
    %114 = memref.load %arg3[%c1_68, %c3_69] : memref<3x4xf32, #tpu.memory_space<smem>>
    memref.store %113, %arg3[%c1_68, %c3_69] : memref<3x4xf32, #tpu.memory_space<smem>>
    %c2_70 = arith.constant 2 : index
    %c3_71 = arith.constant 3 : index
    %115 = memref.load %arg3[%c2_70, %c3_71] : memref<3x4xf32, #tpu.memory_space<smem>>
    %116 = arith.extui %97 : vector<2x256xi1> to vector<2x256xi32>
    %117 = arith.sitofp %116 : vector<2x256xi32> to vector<2x256xf32>
    %118 = vector.shape_cast %117 : vector<2x256xf32> to vector<1x2x256xf32>
    %cst_72 = arith.constant dense<0.000000e+00> : vector<1xf32>
    %119 = vector.multi_reduction <add>, %118, %cst_72 [1, 2] : vector<1x2x256xf32> to vector<1xf32>
    %120 = vector.shape_cast %119 : vector<1xf32> to vector<1x1x1xf32>
    %121 = vector.extract %120[0, 0, 0] : f32 from vector<1x1x1xf32>
    %122 = arith.addf %115, %121 : f32
    %c2_73 = arith.constant 2 : index
    %c3_74 = arith.constant 3 : index
    %123 = memref.load %arg3[%c2_73, %c3_74] : memref<3x4xf32, #tpu.memory_space<smem>>
    memref.store %122, %arg3[%c2_73, %c3_74] : memref<3x4xf32, #tpu.memory_space<smem>>
    return
  }
  func.func @transform_0(%arg0: i32) -> (i32, i32, i32) {
    %c0_i32 = arith.constant 0 : i32
    %c0_i32_0 = arith.constant 0 : i32
    %c0_i32_1 = arith.constant 0 : i32
    return %c0_i32, %c0_i32_0, %arg0 : i32, i32, i32
  }
  func.func @transform_1(%arg0: i32) -> (i32, i32) {
    %c0_i32 = arith.constant 0 : i32
    %c0_i32_0 = arith.constant 0 : i32
    return %c0_i32, %arg0 : i32, i32
  }
  func.func @transform_2(%arg0: i32) -> (i32, i32) {
    %c0_i32 = arith.constant 0 : i32
    %c0_i32_0 = arith.constant 0 : i32
    %c0_i32_1 = arith.constant 0 : i32
    return %c0_i32, %c0_i32_0 : i32, i32
  }
}

</mosaic_0001>

<bundles_post_ra>
// kernel: tpu_custom_call.1
= control target key start
LH: loop header
LB: loop body
LE: loop exit
PB: predicated region body
PF: predicated region fallthrough
CT: control target
= control target key end

     0   :  { %7 = vsyncpa [#allocation3], 0  ;;  %s810_s0 = inlined_call_operand.hbm [shape: f32[2,4,256], index: 0, kind: input, shape index: {}]   ;;  %s811_s1 = inlined_call_operand.hbm [shape: s32[2,256], index: 1, kind: input, shape index: {}]   ;;  %s812_s2 = inlined_call_operand.hbm [shape: f32[3,4], index: 2, kind: output, shape index: {}]  }
   0x1   :  { %8 = vsyncpa [#allocation6], 0 }
   0x2   :  { %9 = vsyncpa [#allocation4], 0  ;;  %s663_s9 = smov [#allocation2]   ;;  %s603_s13 = scalar_lea.hbm %s810_s0, 256 }
   0x3   :  { %s15_s10 = sshll.u32 %s663_s9, 4  ;;  %p604_p0 = scmp.ne.s32.totalorder %s810_s0, %s603_s13  ;;  %s16_s10 = int_to_ptr.vmem [resolvable:$true] %s15_s10 }
   0x4   :  { %p607_p1 = scmp.lt.u32.totalorder %s603_s13, %s810_s0 }
   0x6   :  { %p609_p2 = pnand %p607_p1, %p604_p0 }
   0x8   :  { %612 = shalt.err (!%p609_p2)
}
   0x9   :  { %s613_s18 = scalar_lea.vmem %s16_s10, 256  ;;  %p618_p4 = scmp.lt.s32.totalorder %s16_s10, %s16_s10 }
   0xa   :  { %p614_p3 = scmp.ne.s32.totalorder %s16_s10, %s613_s18  ;;  %p619_p5 = scmp.lt.s32.totalorder %s613_s18, %s613_s18 }
   0xc   :  { %p620_p6 = por %p619_p5, %p618_p4 }
   0xe   :  { %p621_p7 = pnand %p620_p6, %p614_p3 }
  0x10   :  { %624 = shalt.err (!%p621_p7)
}
  0x11   :  { %s664_s19 = smov 128   ;;  %s665_s20 = smov 8  }
  0x12   :  { %21 = dma.hbm_to_vmem [thread:$0]  %s810_s0, 256, %s16_s10, [#allocation3], %s664_s19, %s664_s19, %s665_s20  }
  0x13   :  { %s666_s23 = smov [#allocation5]   ;;  %s625_s27 = scalar_lea.hbm %s811_s1, 64 }
  0x14   :  { %s28_s24 = sshll.u32 %s666_s23, 4  ;;  %p626_p8 = scmp.ne.s32.totalorder %s811_s1, %s625_s27  ;;  %s29_s24 = int_to_ptr.vmem [resolvable:$true] %s28_s24 }
  0x15   :  { %p629_p9 = scmp.lt.u32.totalorder %s625_s27, %s811_s1 }
  0x17   :  { %p631_p10 = pnand %p629_p9, %p626_p8 }
  0x19   :  { %634 = shalt.err (!%p631_p10)
}
  0x1a   :  { %s635_s4 = scalar_lea.vmem %s29_s24, 64  ;;  %p640_p12 = scmp.lt.s32.totalorder %s29_s24, %s29_s24 }
  0x1b   :  { %p636_p11 = scmp.ne.s32.totalorder %s29_s24, %s635_s4  ;;  %p641_p13 = scmp.lt.s32.totalorder %s635_s4, %s635_s4 }
  0x1d   :  { %p642_p0 = por %p641_p13, %p640_p12 }
  0x1f   :  { %p643_p1 = pnand %p642_p0, %p636_p11 }
  0x21   :  { %646 = shalt.err (!%p643_p1)
}
  0x22   :  { %31 = dma.hbm_to_vmem [thread:$0]  %s811_s1, 64, %s29_s24, [#allocation6]  }
  0x23   :  { %657 = dma.done.wait [#allocation3], 256  }
  0x24   :  { %658 = vsyncadd [#allocation3], 4294967040 }
  0x25   :  { %659 = dma.done.wait [#allocation6], 64  }
  0x26   :  { %660 = vsyncadd [#allocation6], 4294967232  ;;  %v78_v0 = vlaneseq  ;;  %v667_v1 = vmov 1983009808   ;;  %v668_v4 = vmov 1966171168  }
  0x27   :  { %v86_v2 = vunpack.c.l.s4 %v667_v1  ;;  %v118_v5 = vunpack.c.l.s4 %v668_v4  ;;  %v669_v6 = vmov 1935823168   ;;  %v713_v12 = vld [vmem:[#allocation5] sm:$0xf]  ;;  %vm95_vm0 = vcmask 1041408   ;;  %s647_s19 = scalar_lea.hbm %s812_s2, 64 }
  0x28   :  { %v79_v3 = vshrl.u32 %v78_v0, 7  ;;  %v76_v7 = vunpack.c.l.s4 %v669_v6  ;;  %v67_v14 = vld [vmem:[#allocation2] ss:$4 sm:$0x3]  ;;  %vm307_vm1 = vcmp.eq.s32.totalorder %v713_v12, 2  ;;  %vm70_vm2 = vcmp.eq.s32.totalorder %v713_v12, 0  ;;  %p648_p2 = scmp.ne.s32.totalorder %s812_s2, %s647_s19  ;;  %p651_p3 = scmp.lt.u32.totalorder %s647_s19, %s812_s2 }
  0x29   :  { %v87_v8 = vunpack.c.0.s8 %v86_v2  ;;  %v119_v9 = vunpack.c.0.s8 %v118_v5  ;;  %vm189_vm3 = vcmp.eq.s32.totalorder %v713_v12, 1  ;;  %v69_v16 = vld [vmem:[#allocation2 + $0x8] ss:$4 sm:$0x3]  ;;  %v112_v17 = vmul.f32 %v67_v14, %v67_v14 }
  0x2a   :  { %v77_v10 = vunpack.c.0.s8 %v76_v7  ;;  %v670_v18 = vmov 0.0   ;;  %v74_v22 = vcombine.low %v67_v14, %v69_v16  ;;  %v186_v23 = vld [vmem:[#allocation2 + $0x1] ss:$4 sm:$0x3]  ;;  %v113_v29 = vmul.f32 %v69_v16, %v69_v16  ;;  %p653_p4 = pnand %p651_p3, %p648_p2 }
  0x2b   :  { %v711_v11 = vsub.s32 %v87_v8, %v79_v3  ;;  %v715_v13 = vsub.s32 %v119_v9, %v79_v3  ;;  %v564_v19 = vsel %vm307_vm1, 1.0, %v670_v18  ;;  %v556_v20 = vsel %vm70_vm2, 1.0, %v670_v18  ;;  %v188_v27 = vld [vmem:[#allocation2 + $0x9] ss:$4 sm:$0x3] }
  0x2c   :  { %v80_v15 = vsub.s32 %v77_v10, %v79_v3  ;;  %v560_v21 = vsel %vm189_vm3, 1.0, %v670_v18  ;;  %v304_v28 = vld [vmem:[#allocation2 + $0x2] ss:$4 sm:$0x3]  ;;  %v193_v31 = vcombine.low %v186_v23, %v188_v27  ;;  %v732_v34 = vmul.f32 %v186_v23, %v186_v23 }
  0x2d   :  { %v402_v24 = vrot.slane %v564_v19, %v711_v11  ;;  %v166_v25 = vrot.slane %v556_v20, %v711_v11  ;;  %v284_v26 = vrot.slane %v560_v21, %v711_v11  ;;  %v306_v32 = vld [vmem:[#allocation2 + $0xa] ss:$4 sm:$0x3]  ;;  %v348_v33 = vmul.f32 %v304_v28, %v304_v28  ;;  %v739_v43 = vld [vmem:[#allocation2 + $0x3] ss:$4 sm:$0x3] }
  0x2e   :  { %v81_v30 = vrot.slane %v74_v22, %v80_v15  ;;  %v200_v42 = vrot.slane %v193_v31, %v80_v15  ;;  %v311_v47 = vcombine.low %v304_v28, %v306_v32  ;;  %v744_v48 = vld [vmem:[#allocation2 + $0xb] ss:$4 sm:$0x3]  ;;  %vm425_vm4 = vcmp.eq.s32.totalorder %v713_v12, 3 }
  0x2f   :  { %v403_v35 = vcombine.high %v402_v24, %v402_v24  ;;  %v406_v36 = vsel %vm95_vm0, %v402_v24, 0.0  ;;  %v167_v37 = vcombine.high %v166_v25, %v166_v25  ;;  %v170_v38 = vsel %vm95_vm0, %v166_v25, 0.0 }
  0x30   :  { %v285_v39 = vcombine.high %v284_v26, %v284_v26  ;;  %v288_v40 = vsel %vm95_vm0, %v284_v26, 0.0  ;;  %v83_v41 = vsel %vm70_vm2, %v81_v30, 0.0  ;;  %v202_v52 = vsel %vm189_vm3, %v200_v42, 0.0 }
  0x31   :  { %v407_v44 = vsel %vm95_vm0, %v403_v35, 0.0  ;;  %v171_v45 = vsel %vm95_vm0, %v167_v37, 0.0  ;;  %v91_v46 = vrot.slane %v83_v41, %v711_v11  ;;  %v210_v56 = vrot.slane %v202_v52, %v711_v11 }
  0x32   :  { %v408_v49 = vadd.f32 %v407_v44, %v406_v36  ;;  %v172_v50 = vadd.f32 %v171_v45, %v170_v38  ;;  %v289_v51 = vsel %vm95_vm0, %v285_v39, 0.0  ;;  %v318_v57 = vrot.slane %v311_v47, %v80_v15 }
  0x33   :  { %v290_v53 = vadd.f32 %v289_v51, %v288_v40  ;;  %v92_v54 = vcombine.high %v91_v46, %v91_v46  ;;  %v96_v55 = vsel %vm95_vm0, %v91_v46, 0.0  ;;  %v429_v58 = vcombine.low %v739_v43, %v744_v48 }
  0x34   :  { %409 = vadd.xlane.f32.xlu0 %v408_v49  ;;  %173 = vadd.xlane.f32.xlu1 %v172_v50  ;;  %v116_v59 = vcombine.low %v112_v17, %v113_v29  ;;  %v211_v61 = vcombine.high %v210_v56, %v210_v56  ;;  %v214_v62 = vsel %vm95_vm0, %v210_v56, 0.0  ;;  %v349_v63 = vmul.f32 %v306_v32, %v306_v32 }
  0x35   :  { %v97_v60 = vsel %vm95_vm0, %v92_v54, 0.0  ;;  %v320_v1 = vsel %vm307_vm1, %v318_v57, 0.0  ;;  %v436_v2 = vrot.slane %v429_v58, %v80_v15  ;;  %v231_v7 = vmul.f32 %v188_v27, %v188_v27 }
  0x36   :  { %v98_v0 = vadd.f32 %v97_v60, %v96_v55  ;;  %v123_v3 = vrot.slane %v116_v59, %v715_v13  ;;  %v215_v4 = vsel %vm95_vm0, %v211_v61, 0.0  ;;  %v328_v5 = vrot.slane %v320_v1, %v711_v11 }
  0x37   :  { %v352_v6 = vcombine.low %v348_v33, %v349_v63  ;;  %v216_v8 = vadd.f32 %v215_v4, %v214_v62  ;;  %v438_v9 = vsel %vm425_vm4, %v436_v2, 0.0  ;;  %v234_v22 = vcombine.low %v732_v34, %v231_v7 }
  0x38   :  { %291 = vadd.xlane.f32.xlu1 %v290_v53  ;;  %99 = vadd.xlane.f32.xlu0 %v98_v0  ;;  %v124_v10 = vcombine.high %v123_v3, %v123_v3  ;;  %v131_v14 = vrot.slane %v123_v3, %v715_v13  ;;  %v329_v16 = vcombine.high %v328_v5, %v328_v5  ;;  %v332_v15 = vsel %vm95_vm0, %v328_v5, 0.0 }
  0x39   :  { %v446_v17 = vrot.slane %v438_v9, %v711_v11  ;;  %v359_v19 = vrot.slane %v352_v6, %v715_v13  ;;  %v568_v23 = vsel %vm425_vm4, 1.0, %v670_v18  ;;  %v241_v31 = vrot.slane %v234_v22, %v715_v13 }
  0x3a   :  { %v138_v20 = vrot.slane %v124_v10, %v715_v13  ;;  %v141_v21 = vsel %vm95_vm0, %v131_v14, 0.0  ;;  %v333_v24 = vsel %vm95_vm0, %v329_v16, 0.0  ;;  %v520_v18 = vrot.slane %v568_v23, %v711_v11 }
  0x3b   :  { %v447_v25 = vcombine.high %v446_v17, %v446_v17  ;;  %v450_v26 = vsel %vm95_vm0, %v446_v17, 0.0  ;;  %v360_v27 = vcombine.high %v359_v19, %v359_v19  ;;  %v334_v28 = vadd.f32 %v333_v24, %v332_v15 }
  0x3c   :  { %217 = vadd.xlane.f32.xlu1 %v216_v8  ;;  %v142_v29 = vsel %vm95_vm0, %v138_v20, 0.0  ;;  %v367_v30 = vrot.slane %v359_v19, %v715_v13  ;;  %v242_v36 = vcombine.high %v241_v31, %v241_v31  ;;  %v249_v37 = vrot.slane %v241_v31, %v715_v13 }
  0x3d   :  { %v451_v32 = vsel %vm95_vm0, %v447_v25, 0.0  ;;  %v143_v33 = vadd.f32 %v142_v29, %v141_v21  ;;  %v374_v12 = vrot.slane %v360_v27, %v715_v13  ;;  %335 = vadd.xlane.f32.xlu0 %v334_v28  ;;  %v521_v39 = vcombine.high %v520_v18, %v520_v18 }
  0x3e   :  { %v452_v34 = vadd.f32 %v451_v32, %v450_v26  ;;  %v377_v35 = vsel %vm95_vm0, %v367_v30, 0.0  ;;  %v466_v40 = vmul.f32 %v739_v43, %v739_v43  ;;  %v256_v42 = vrot.slane %v242_v36, %v715_v13 }
  0x3f   :  { %v378_v38 = vsel %vm95_vm0, %v374_v12, 0.0  ;;  %v259_v44 = vsel %vm95_vm0, %v249_v37, 0.0  ;;  %v467_v11 = vmul.f32 %v744_v48, %v744_v48  ;;  %v524_v45 = vsel %vm95_vm0, %v520_v18, 0.0 }
  0x40   :  { %453 = vadd.xlane.f32.xlu1 %v452_v34  ;;  %v379_v41 = vadd.f32 %v378_v38, %v377_v35  ;;  %v525_v46 = vsel %vm95_vm0, %v521_v39, 0.0  ;;  %v260_v47 = vsel %vm95_vm0, %v256_v42, 0.0 }
  0x41   :  { %144 = vadd.xlane.f32.xlu0 %v143_v33  ;;  %v470_v49 = vcombine.low %v466_v40, %v467_v11  ;;  %v261_v50 = vadd.f32 %v260_v47, %v259_v44  ;;  %v526_v43 = vadd.f32 %v525_v46, %v524_v45 }
  0x43   :  { %v477_v51 = vrot.slane %v470_v49, %v715_v13 }
  0x44   :  { %380 = vadd.xlane.f32.xlu1 %v379_v41 }
  0x45   :  { %262 = vadd.xlane.f32.xlu0 %v261_v50  ;;  %v478_v52 = vcombine.high %v477_v51, %v477_v51  ;;  %v485_v53 = vrot.slane %v477_v51, %v715_v13 }
  0x47   :  { %v492_v48 = vrot.slane %v478_v52, %v715_v13  ;;  %v495_v54 = vsel %vm95_vm0, %v485_v53, 0.0 }
  0x48   :  { %527 = vadd.xlane.f32.xlu1 %v526_v43 }
  0x49   :  { %v496_v55 = vsel %vm95_vm0, %v492_v48, 0.0 }
  0x4a   :  { %v497_v56 = vadd.f32 %v496_v55, %v495_v54 }
  0x4c   :  { %498 = vadd.xlane.f32.xlu0 %v497_v56 }
  0xc1   :  { %v410_v57 = vpop.xlane.xlu0 %409  ;;  %v174_v58 = vpop.xlane.xlu1 %173 }
  0xc2   :  { %v175_v59 = vrot.slane %v174_v58, 4  ;;  %v411_v8 = vrot.slane %v410_v57, 4 }
  0xc4   :  { %v176_v0 = vadd.f32 %v175_v59, %v174_v58  ;;  %v412_v23 = vadd.f32 %v411_v8, %v410_v57 }
  0xc5   :  { %v292_v60 = vpop.xlane.xlu1 %291  ;;  %v100_v61 = vpop.xlane.xlu0 %99 }
  0xc6   :  { %v101_v62 = vrot.slane %v100_v61, 4  ;;  %v293_v4 = vrot.slane %v292_v60, 4  ;;  %v177_v9 = vrot.slane %v176_v0, 2  ;;  %v413_v34 = vrot.slane %v412_v23, 2 }
  0xc8   :  { %v102_v63 = vadd.f32 %v101_v62, %v100_v61  ;;  %v294_v16 = vadd.f32 %v293_v4, %v292_v60  ;;  %v178_v25 = vadd.f32 %v177_v9, %v176_v0  ;;  %v414_v50 = vadd.f32 %v413_v34, %v412_v23 }
  0xc9   :  { %v218_v1 = vpop.xlane.xlu1 %217 }
  0xca   :  { %v103_v2 = vrot.slane %v102_v63, 2  ;;  %v219_v3 = vrot.slane %v218_v1, 4  ;;  %v336_v5 = vpop.xlane.xlu0 %335  ;;  %v295_v28 = vrot.slane %v294_v16, 2  ;;  %v179_v36 = vrot.slane %v178_v25, 1 }
  0xcb   :  { %v337_v6 = vrot.slane %v336_v5, 4  ;;  %v415_v0 = vrot.slane %v414_v50, 1 }
  0xcc   :  { %v220_v13 = vadd.f32 %v219_v3, %v218_v1  ;;  %v104_v7 = vadd.f32 %v103_v2, %v102_v63  ;;  %v296_v44 = vadd.f32 %v295_v28, %v294_v16  ;;  %v180_v53 = vadd.f32 %v179_v36, %v178_v25 }
  0xcd   :  { %v454_v10 = vpop.xlane.xlu1 %453  ;;  %v338_v17 = vadd.f32 %v337_v6, %v336_v5 }
  0xce   :  { %v105_v14 = vrot.slane %v104_v7, 1  ;;  %v221_v15 = vrot.slane %v220_v13, 2  ;;  %v455_v19 = vrot.slane %v454_v10, 4  ;;  %v145_v20 = vpop.xlane.xlu0 %144  ;;  %v297_v55 = vrot.slane %v296_v44, 1 }
  0xcf   :  { %v146_v21 = vrot.slane %v145_v20, 4  ;;  %v339_v29 = vrot.slane %v338_v17, 2 }
  0xd0   :  { %v106_v22 = vadd.f32 %v105_v14, %v104_v7  ;;  %v456_v30 = vadd.f32 %v455_v19, %v454_v10  ;;  %v222_v32 = vadd.f32 %v221_v15, %v220_v13  ;;  %v298_v2 = vadd.f32 %v297_v55, %v296_v44 }
  0xd1   :  { %v381_v24 = vpop.xlane.xlu1 %380  ;;  %v147_v26 = vadd.f32 %v146_v21, %v145_v20  ;;  %v340_v11 = vadd.f32 %v339_v29, %v338_v17  ;;  %v416_v7 = vadd.f32 %v415_v0, %v414_v50 }
  0xd2   :  { %v382_v27 = vrot.slane %v381_v24, 4  ;;  %569 = vpush %v106_v22  ;;  %v263_v31 = vpop.xlane.xlu0 %262  ;;  %v457_v41 = vrot.slane %v456_v30, 2  ;;  %v223_v42 = vrot.slane %v222_v32, 1 }
  0xd3   :  { %v148_v33 = vrot.slane %v147_v26, 2  ;;  %v264_v18 = vrot.slane %v263_v31, 4  ;;  %v341_v61 = vrot.slane %v340_v11, 1 }
  0xd4   :  { %v383_v12 = vadd.f32 %v382_v27, %v381_v24  ;;  %v458_v57 = vadd.f32 %v457_v41, %v456_v30  ;;  %v224_v59 = vadd.f32 %v223_v42, %v222_v32 }
  0xd5   :  { %v528_v35 = vpop.xlane.xlu1 %527  ;;  %v265_v38 = vadd.f32 %v264_v18, %v263_v31  ;;  %v149_v40 = vadd.f32 %v148_v33, %v147_v26  ;;  %v342_v5 = vadd.f32 %v341_v61, %v340_v11 }
  0xd6   :  { %v384_v37 = vrot.slane %v383_v12, 2  ;;  %v529_v39 = vrot.slane %v528_v35, 4  ;;  %v459_v4 = vrot.slane %v458_v57, 1 }
  0xd7   :  { %v266_v45 = vrot.slane %v265_v38, 2  ;;  %v150_v47 = vrot.slane %v149_v40, 1 }
  0xd8   :  { %v530_v46 = vadd.f32 %v529_v39, %v528_v35  ;;  %v385_v49 = vadd.f32 %v384_v37, %v383_v12  ;;  %v460_v8 = vadd.f32 %v459_v4, %v458_v57 }
  0xd9   :  { %v499_v51 = vpop.xlane.xlu0 %498  ;;  %v151_v52 = vadd.f32 %v150_v47, %v149_v40  ;;  %v267_v48 = vadd.f32 %v266_v45, %v265_v38 }
  0xda   :  { %v531_v43 = vrot.slane %v530_v46, 2  ;;  %v500_v54 = vrot.slane %v499_v51, 4  ;;  %v386_v56 = vrot.slane %v385_v49, 1 }
  0xdb   :  { %571 = vpush %v151_v52  ;;  %v268_v60 = vrot.slane %v267_v48, 1 }
  0xdc   :  { %v532_v58 = vadd.f32 %v531_v43, %v530_v46  ;;  %v501_v62 = vadd.f32 %v500_v54, %v499_v51  ;;  %573 = vpush %v180_v53  ;;  %v387_v3 = vadd.f32 %v386_v56, %v385_v49 }
  0xdd   :  { %575 = vpush %v224_v59  ;;  %v269_v63 = vadd.f32 %v268_v60, %v267_v48 }
  0xde   :  { %v502_v1 = vrot.slane %v501_v62, 2  ;;  %v533_v13 = vrot.slane %v532_v58, 1 }
  0xdf   :  { %577 = vpush %v269_v63 }
  0xe0   :  { %v503_v6 = vadd.f32 %v502_v1, %v501_v62  ;;  %579 = vpush %v298_v2  ;;  %v534_v10 = vadd.f32 %v533_v13, %v532_v58 }
  0xe1   :  { %581 = vpush %v342_v5 }
  0xe2   :  { %583 = vpush %v387_v3  ;;  %v504_v9 = vrot.slane %v503_v6, 1 }
  0xe3   :  { %585 = vpush %v416_v7 }
  0xe4   :  { %587 = vpush %v460_v8  ;;  %v505_v14 = vadd.f32 %v504_v9, %v503_v6 }
  0xe6   :  { %589 = vpush %v505_v14 }
  0xe7   :  { %591 = vpush %v534_v10 }
 0x103   :  { %s570_s1 = spop %569 }
 0x104   :  { %110 = sst [smem:[#allocation7]] %s570_s1 }
 0x10c   :  { %s572_s6 = spop %571 }
 0x10d   :  { %s574_s7 = spop %573  ;;  %155 = sst [smem:[#allocation7 + $0x80]] %s572_s6 }
 0x10e   :  { %s576_s8 = spop %575  ;;  %184 = sst [smem:[#allocation7 + $0x100]] %s574_s7 }
 0x10f   :  { %228 = sst [smem:[#allocation7 + $0x1]] %s576_s8 }
 0x110   :  { %s578_s9 = spop %577 }
 0x111   :  { %s580_s10 = spop %579  ;;  %273 = sst [smem:[#allocation7 + $0x81]] %s578_s9 }
 0x112   :  { %s582_s11 = spop %581  ;;  %302 = sst [smem:[#allocation7 + $0x101]] %s580_s10 }
 0x113   :  { %s584_s12 = spop %583  ;;  %346 = sst [smem:[#allocation7 + $0x2]] %s582_s11 }
 0x114   :  { %s586_s13 = spop %585  ;;  %391 = sst [smem:[#allocation7 + $0x82]] %s584_s12 }
 0x115   :  { %s588_s14 = spop %587  ;;  %420 = sst [smem:[#allocation7 + $0x102]] %s586_s13 }
 0x116   :  { %464 = sst [smem:[#allocation7 + $0x3]] %s588_s14 }
 0x117   :  { %s590_s15 = spop %589 }
 0x118   :  { %s592_s16 = spop %591  ;;  %509 = sst [smem:[#allocation7 + $0x83]] %s590_s15 }
 0x119   :  { %538 = sst [smem:[#allocation7 + $0x103]] %s592_s16 }
 0x11a   :  { %656 = shalt.err (!%p653_p4)
}
 0x11b   :  { %s671_s24 = smov [#allocation7]  }
 0x11c   :  { %546 = dma.smem_to_hbm %s671_s24, 64, %s812_s2, [#allocation4]  }
 0x11d   :  { %661 = dma.done.wait [#allocation4], 64  }
 0x11e   :  { %662 = vsyncadd [#allocation4], 4294967232 }
 0x11f   :  { %550 = sfence }
 0x120   :  { %551 = vsyncpa [#allocation3], 1 }
 0x121   :  { %552 = vsyncpa [#allocation6], 1 }
 0x122   :  { %553 = vsyncpa [#allocation4], 1 }

</bundles_post_ra>
